<compile_context>
chip_gen: v7x
topology: tpu7x:2x2x1
jax: 0.10.0
libtpu: 0.0.40
codegen_flags: <defaults>
</compile_context>

<pallas_src>
import functools
import math

import jax
import jax.numpy as jnp
import numpy as np
from jax import lax
from jax.experimental import pallas as pl
from jax.experimental.pallas import tpu as pltpu


def _mha_kernel(q_ref, k_ref, v_ref, bias_ref,
                wq_ref, bq_ref, wk_ref, bk_ref, wv_ref, bv_ref,
                wo_ref, bo_ref, hm_ref,
                out_ref, *, d_head, heads_per_step):
    g = pl.program_id(2)                      # head-group (reduction) axis
    G = heads_per_step

    q = q_ref[...]                            # (tq, D)  -- also the residual
    k = k_ref[...]                            # (Lk, D)
    v = v_ref[...]                            # (Lk, D)

    # Wide per-group projections: (L, D) @ (D, G*dh).  The 1/sqrt(d_head) scale
    # is folded into wq/bq on the host, so no in-kernel rescale is needed.
    q_h = jnp.dot(q, wq_ref[...], preferred_element_type=jnp.float32) + bq_ref[...]
    k_h = jnp.dot(k, wk_ref[...], preferred_element_type=jnp.float32) + bk_ref[...]
    v_h = jnp.dot(v, wv_ref[...], preferred_element_type=jnp.float32) + bv_ref[...]

    bias = bias_ref[...]                      # (tq, Lk), -1e7 at masked key slots

    dn = (((1,), (1,)), ((), ()))             # contract last dim of both, no batch
    ctx_parts = []
    for i in range(G):                        # static unroll over heads in the group
        sl = slice(i * d_head, (i + 1) * d_head)
        s = lax.dot_general(q_h[:, sl], k_h[:, sl], dn,
                            preferred_element_type=jnp.float32)
        s = s + bias                          # masked_fill(-1e7) as additive bias
        m = jnp.max(s, axis=-1, keepdims=True)
        e = jnp.exp(s - m)
        p = e * pl.reciprocal(jnp.sum(e, axis=-1, keepdims=True), approx=False)
        # attention dropout: identity at eval.  head_mask is a per-head scalar,
        # applied to the small (tq, dh) context instead of the (tq, Lk) probs.
        ctx = jnp.dot(p, v_h[:, sl], preferred_element_type=jnp.float32)
        ctx_parts.append(ctx * hm_ref[g * G + i])
    ctx_g = ctx_parts[0] if G == 1 else jnp.concatenate(ctx_parts, axis=-1)

    # out block is VMEM-resident across the head-group axis -> accumulate in place.
    @pl.when(g == 0)
    def _init():
        # output dropout: identity at eval. with_residual=True -> add q; + out bias.
        out_ref[...] = q + bo_ref[...]

    out_ref[...] += jnp.dot(ctx_g, wo_ref[...], preferred_element_type=jnp.float32)


def multi_head_attention(q, k, v, attn_mask, head_mask, params, n_head,
                         *, heads_per_step=None, q_block=None):
    B, Lq, D = q.shape
    Lk = k.shape[1]
    assert D % n_head == 0
    d_head = D // n_head

    # Head grouping: target ~256 output lanes per projection matmul (MXU width on
    # v6e/v7x; also >=128 for v5e), and it must divide n_head.
    if heads_per_step is None:
        heads_per_step = max(1, min(n_head, 256 // max(d_head, 1)))
    while n_head % heads_per_step:
        heads_per_step -= 1
    G = heads_per_step
    n_groups = n_head // G
    gw = G * d_head

    # Query-length tiling (bounds the (tq, Lk) f32 score tile, important on v7x's
    # 64 MiB VMEM for long sequences).
    if q_block is None:
        q_block = Lq if Lq <= 512 else 512
    if Lq % q_block != 0:
        q_block = Lq
    nq = Lq // q_block

    # Host-side layout plumbing (no dynamic lane slicing inside the kernel):
    #   * fold 1/sqrt(d_head) into the query projection,
    #   * per-group weight slabs selected by the BlockSpec index_map,
    #   * additive mask bias instead of compare+select.
    scale = jnp.float32(1.0 / math.sqrt(d_head))
    wq_s = (params["wq"] * scale).reshape(D, n_groups, gw).transpose(1, 0, 2)
    wk_s = params["wk"].reshape(D, n_groups, gw).transpose(1, 0, 2)
    wv_s = params["wv"].reshape(D, n_groups, gw).transpose(1, 0, 2)
    bq_s = (params["bq"] * scale).reshape(n_groups, 1, gw)
    bk_s = params["bk"].reshape(n_groups, 1, gw)
    bv_s = params["bv"].reshape(n_groups, 1, gw)
    wo_s = params["wo"].reshape(n_groups, gw, D)
    bo = params["bo"]
    mask_bias = attn_mask.astype(jnp.float32) * jnp.float32(-10000000.0)

    kernel = functools.partial(_mha_kernel, d_head=d_head, heads_per_step=G)

    q_spec = pl.BlockSpec((None, q_block, D), lambda b, qi, g: (b, qi, 0))
    kv_spec = pl.BlockSpec((None, Lk, D), lambda b, qi, g: (b, 0, 0))
    m_spec = pl.BlockSpec((None, q_block, Lk), lambda b, qi, g: (b, qi, 0))
    wqkv_spec = pl.BlockSpec((None, D, gw), lambda b, qi, g: (g, 0, 0))
    bqkv_spec = pl.BlockSpec((None, 1, gw), lambda b, qi, g: (g, 0, 0))
    wo_spec = pl.BlockSpec((None, gw, D), lambda b, qi, g: (g, 0, 0))
    bo_spec = pl.BlockSpec((1, D), lambda b, qi, g: (0, 0))
    hm_spec = pl.BlockSpec(memory_space=pltpu.MemorySpace.SMEM)
    out_spec = pl.BlockSpec((None, q_block, D), lambda b, qi, g: (b, qi, 0))

    return pl.pallas_call(
        kernel,
        out_shape=jax.ShapeDtypeStruct((B, Lq, D), q.dtype),
        grid_spec=pltpu.PrefetchScalarGridSpec(
            num_scalar_prefetch=0,
            grid=(B, nq, n_groups),
            in_specs=[q_spec, kv_spec, kv_spec, m_spec,
                      wqkv_spec, bqkv_spec,   # query projection slab
                      wqkv_spec, bqkv_spec,   # key projection slab
                      wqkv_spec, bqkv_spec,   # value projection slab
                      wo_spec, bo_spec,       # output projection slab + bias
                      hm_spec],
            out_specs=out_spec,
        ),
        compiler_params=pltpu.CompilerParams(
            dimension_semantics=("parallel", "parallel", "arbitrary")),
    )(q, k, v, mask_bias,
      wq_s, bq_s, wk_s, bk_s, wv_s, bv_s, wo_s, bo,
      head_mask.astype(jnp.float32))


def _reference(q, k, v, attn_mask, head_mask, params, n_head):
    """Pure-JAX re-implementation of the torch forward (eval mode)."""
    B, Lq, D = q.shape
    Lk = k.shape[1]
    d_head = D // n_head

    def proj(x, w, b):
        return x @ w + b  # (B, L, D)

    qp = proj(q, params["wq"], params["bq"]).reshape(B, Lq, n_head, d_head)
    kp = proj(k, params["wk"], params["bk"]).reshape(B, Lk, n_head, d_head)
    vp = proj(v, params["wv"], params["bv"]).reshape(B, Lk, n_head, d_head)

    qp = jnp.transpose(qp, (2, 0, 1, 3))  # (H, B, Lq, d)
    kp = jnp.transpose(kp, (2, 0, 1, 3))
    vp = jnp.transpose(vp, (2, 0, 1, 3))

    scores = jnp.einsum("hbqd,hbkd->hbqk", qp, kp) / math.sqrt(d_head)
    scores = jnp.where(attn_mask[None, :, :, :] > 0.5, -10000000.0, scores)
    probs = jax.nn.softmax(scores, axis=-1)
    probs = probs * head_mask[:, None, None, None]
    ctx = jnp.einsum("hbqk,hbkd->hbqd", probs, vp)       # (H, B, Lq, d)
    ctx = jnp.transpose(ctx, (1, 2, 0, 3)).reshape(B, Lq, D)
    out = ctx @ params["wo"] + params["bo"]
    return out + q  # residual, no LayerNorm, dropout = identity


def _init_params(key, D):
    ks = jax.random.split(key, 8)
    scale = 1.0 / math.sqrt(D)

    def lin(kw, kb):
        w = jax.random.uniform(kw, (D, D), jnp.float32, -scale, scale)
        b = jax.random.uniform(kb, (1, D), jnp.float32, -scale, scale)
        return w, b

    wq, bq = lin(ks[0], ks[1])
    wk, bk = lin(ks[2], ks[3])
    wv, bv = lin(ks[4], ks[5])
    wo, bo = lin(ks[6], ks[7])
    return dict(wq=wq, bq=bq, wk=wk, bk=bk, wv=wv, bv=bv, wo=wo, bo=bo)


if __name__ == "__main__":
    B, L, D, H = 2, 8, 32, 4  # batch, seq, model_dim, attention_heads

    key = jax.random.PRNGKey(0)
    kq, kk, kv, kp = jax.random.split(key, 4)
    q = jax.random.normal(kq, (B, L, D), jnp.float32)
    k = jax.random.normal(kk, (B, L, D), jnp.float32)
    v = jax.random.normal(kv, (B, L, D), jnp.float32)

    # attention_mask: 1.0 == masked. Mask out the last 2 key positions for batch 0,
    # last 3 for batch 1 (broadcast over query rows).
    attn_mask = np.zeros((B, L, L), np.float32)
    attn_mask[0, :, L - 2:] = 1.0
    attn_mask[1, :, L - 3:] = 1.0
    attn_mask = jnp.asarray(attn_mask)

    # per-head scalar head_mask
    head_mask = jnp.array([1.0, 1.0, 0.5, 1.0], jnp.float32)

    params = _init_params(kp, D)

    out = multi_head_attention(q, k, v, attn_mask, head_mask, params, H)
    out = jax.block_until_ready(out)

    ref = _reference(q, k, v, attn_mask, head_mask, params, H)
    np.testing.assert_allclose(np.asarray(out), np.asarray(ref), rtol=1e-5, atol=1e-5)

    print("KERNEL_OK")
</pallas_src>

<mosaic_0001>
module attributes {stable_mosaic.version = 11 : i64} {
  func.func @_mha_kernel(%arg0: i32, %arg1: i32, %arg2: i32, %arg3: memref<1x8x32xf32, #tpu.memory_space<vmem>>, %arg4: memref<1x8x32xf32, #tpu.memory_space<vmem>>, %arg5: memref<1x8x32xf32, #tpu.memory_space<vmem>>, %arg6: memref<1x8x8xf32, #tpu.memory_space<vmem>>, %arg7: memref<1x32x32xf32, #tpu.memory_space<vmem>>, %arg8: memref<1x1x32xf32, #tpu.memory_space<vmem>>, %arg9: memref<1x32x32xf32, #tpu.memory_space<vmem>>, %arg10: memref<1x1x32xf32, #tpu.memory_space<vmem>>, %arg11: memref<1x32x32xf32, #tpu.memory_space<vmem>>, %arg12: memref<1x1x32xf32, #tpu.memory_space<vmem>>, %arg13: memref<1x32x32xf32, #tpu.memory_space<vmem>>, %arg14: memref<1x32xf32, #tpu.memory_space<vmem>>, %arg15: memref<4xf32, #tpu.memory_space<smem>>, %arg16: memref<1x8x32xf32, #tpu.memory_space<vmem>>) attributes {dimension_semantics = [#tpu.dimension_semantics<parallel>, #tpu.dimension_semantics<parallel>, #tpu.dimension_semantics<arbitrary>], iteration_bounds = array<i64: 2, 1, 1>, scalar_prefetch = 0 : i64, scratch_operands = 0 : i64, tpu.core_type = #tpu.core_type<tc>, window_params = [{transform_indices = @transform_0, window_bounds = array<i64: 1, 8, 32>}, {transform_indices = @transform_1, window_bounds = array<i64: 1, 8, 32>}, {transform_indices = @transform_2, window_bounds = array<i64: 1, 8, 32>}, {transform_indices = @transform_3, window_bounds = array<i64: 1, 8, 8>}, {transform_indices = @transform_4, window_bounds = array<i64: 1, 32, 32>}, {transform_indices = @transform_5, window_bounds = array<i64: 1, 1, 32>}, {transform_indices = @transform_6, window_bounds = array<i64: 1, 32, 32>}, {transform_indices = @transform_7, window_bounds = array<i64: 1, 1, 32>}, {transform_indices = @transform_8, window_bounds = array<i64: 1, 32, 32>}, {transform_indices = @transform_9, window_bounds = array<i64: 1, 1, 32>}, {transform_indices = @transform_10, window_bounds = array<i64: 1, 32, 32>}, {pipeline_mode = #tpu.pipeline_mode<synchronous>, transform_indices = @transform_11, window_bounds = array<i64: 1, 32>}, {transform_indices = @transform_12, window_bounds = array<i64: 4>}, {transform_indices = @transform_13, window_bounds = array<i64: 1, 8, 32>}]} {
    %c0 = arith.constant 0 : index
    %c0_0 = arith.constant 0 : index
    %c0_1 = arith.constant 0 : index
    %0 = vector.load %arg3[%c0, %c0_0, %c0_1] : memref<1x8x32xf32, #tpu.memory_space<vmem>>, vector<1x8x32xf32>
    %1 = vector.shape_cast %0 : vector<1x8x32xf32> to vector<8x32xf32>
    %c0_2 = arith.constant 0 : index
    %c0_3 = arith.constant 0 : index
    %c0_4 = arith.constant 0 : index
    %2 = vector.load %arg4[%c0_2, %c0_3, %c0_4] : memref<1x8x32xf32, #tpu.memory_space<vmem>>, vector<1x8x32xf32>
    %3 = vector.shape_cast %2 : vector<1x8x32xf32> to vector<8x32xf32>
    %c0_5 = arith.constant 0 : index
    %c0_6 = arith.constant 0 : index
    %c0_7 = arith.constant 0 : index
    %4 = vector.load %arg5[%c0_5, %c0_6, %c0_7] : memref<1x8x32xf32, #tpu.memory_space<vmem>>, vector<1x8x32xf32>
    %5 = vector.shape_cast %4 : vector<1x8x32xf32> to vector<8x32xf32>
    %c0_8 = arith.constant 0 : index
    %c0_9 = arith.constant 0 : index
    %c0_10 = arith.constant 0 : index
    %6 = vector.load %arg7[%c0_8, %c0_9, %c0_10] : memref<1x32x32xf32, #tpu.memory_space<vmem>>, vector<1x32x32xf32>
    %7 = vector.shape_cast %6 : vector<1x32x32xf32> to vector<32x32xf32>
    %cst = arith.constant dense<0.000000e+00> : vector<8x32xf32>
    %8 = tpu.matmul %1, %7, %cst {dimension_numbers = #tpu.dot_dimension_numbers<[1], [0], [0], [1], [0, 0, 1, 1], [], []>} : vector<8x32xf32>, vector<32x32xf32>, vector<8x32xf32> -> vector<8x32xf32>
    %c0_11 = arith.constant 0 : index
    %c0_12 = arith.constant 0 : index
    %c0_13 = arith.constant 0 : index
    %9 = vector.load %arg8[%c0_11, %c0_12, %c0_13] : memref<1x1x32xf32, #tpu.memory_space<vmem>>, vector<1x1x32xf32>
    %10 = vector.shape_cast %9 : vector<1x1x32xf32> to vector<1x32xf32>
    %11 = vector.broadcast %10 : vector<1x32xf32> to vector<8x32xf32>
    %12 = arith.addf %8, %11 : vector<8x32xf32>
    %c0_14 = arith.constant 0 : index
    %c0_15 = arith.constant 0 : index
    %c0_16 = arith.constant 0 : index
    %13 = vector.load %arg9[%c0_14, %c0_15, %c0_16] : memref<1x32x32xf32, #tpu.memory_space<vmem>>, vector<1x32x32xf32>
    %14 = vector.shape_cast %13 : vector<1x32x32xf32> to vector<32x32xf32>
    %cst_17 = arith.constant dense<0.000000e+00> : vector<8x32xf32>
    %15 = tpu.matmul %3, %14, %cst_17 {dimension_numbers = #tpu.dot_dimension_numbers<[1], [0], [0], [1], [0, 0, 1, 1], [], []>} : vector<8x32xf32>, vector<32x32xf32>, vector<8x32xf32> -> vector<8x32xf32>
    %c0_18 = arith.constant 0 : index
    %c0_19 = arith.constant 0 : index
    %c0_20 = arith.constant 0 : index
    %16 = vector.load %arg10[%c0_18, %c0_19, %c0_20] : memref<1x1x32xf32, #tpu.memory_space<vmem>>, vector<1x1x32xf32>
    %17 = vector.shape_cast %16 : vector<1x1x32xf32> to vector<1x32xf32>
    %18 = vector.broadcast %17 : vector<1x32xf32> to vector<8x32xf32>
    %19 = arith.addf %15, %18 : vector<8x32xf32>
    %c0_21 = arith.constant 0 : index
    %c0_22 = arith.constant 0 : index
    %c0_23 = arith.constant 0 : index
    %20 = vector.load %arg11[%c0_21, %c0_22, %c0_23] : memref<1x32x32xf32, #tpu.memory_space<vmem>>, vector<1x32x32xf32>
    %21 = vector.shape_cast %20 : vector<1x32x32xf32> to vector<32x32xf32>
    %cst_24 = arith.constant dense<0.000000e+00> : vector<8x32xf32>
    %22 = tpu.matmul %5, %21, %cst_24 {dimension_numbers = #tpu.dot_dimension_numbers<[1], [0], [0], [1], [0, 0, 1, 1], [], []>} : vector<8x32xf32>, vector<32x32xf32>, vector<8x32xf32> -> vector<8x32xf32>
    %c0_25 = arith.constant 0 : index
    %c0_26 = arith.constant 0 : index
    %c0_27 = arith.constant 0 : index
    %23 = vector.load %arg12[%c0_25, %c0_26, %c0_27] : memref<1x1x32xf32, #tpu.memory_space<vmem>>, vector<1x1x32xf32>
    %24 = vector.shape_cast %23 : vector<1x1x32xf32> to vector<1x32xf32>
    %25 = vector.broadcast %24 : vector<1x32xf32> to vector<8x32xf32>
    %26 = arith.addf %22, %25 : vector<8x32xf32>
    %c0_28 = arith.constant 0 : index
    %c0_29 = arith.constant 0 : index
    %c0_30 = arith.constant 0 : index
    %27 = vector.load %arg6[%c0_28, %c0_29, %c0_30] : memref<1x8x8xf32, #tpu.memory_space<vmem>>, vector<1x8x8xf32>
    %28 = vector.shape_cast %27 : vector<1x8x8xf32> to vector<8x8xf32>
    %29 = vector.extract_strided_slice %12 {offsets = [0, 0], sizes = [8, 8], strides = [1, 1]} : vector<8x32xf32> to vector<8x8xf32>
    %30 = vector.extract_strided_slice %19 {offsets = [0, 0], sizes = [8, 8], strides = [1, 1]} : vector<8x32xf32> to vector<8x8xf32>
    %cst_31 = arith.constant dense<0.000000e+00> : vector<8x8xf32>
    %31 = tpu.matmul %29, %30, %cst_31 {dimension_numbers = #tpu.dot_dimension_numbers<[1], [1], [0], [0], [0, 0, 1, 0], [], []>} : vector<8x8xf32>, vector<8x8xf32>, vector<8x8xf32> -> vector<8x8xf32>
    %32 = arith.addf %31, %28 : vector<8x8xf32>
    %cst_32 = arith.constant dense<0xFF800000> : vector<8xf32>
    %33 = vector.multi_reduction <maximumf>, %32, %cst_32 [1] : vector<8x8xf32> to vector<8xf32>
    %34 = vector.shape_cast %33 : vector<8xf32> to vector<8x1xf32>
    %35 = vector.broadcast %34 : vector<8x1xf32> to vector<8x8xf32>
    %36 = arith.subf %32, %35 : vector<8x8xf32>
    %37 = math.exp %36 : vector<8x8xf32>
    %cst_33 = arith.constant dense<0.000000e+00> : vector<8xf32>
    %38 = vector.multi_reduction <add>, %37, %cst_33 [1] : vector<8x8xf32> to vector<8xf32>
    %39 = vector.shape_cast %38 : vector<8xf32> to vector<8x1xf32>
    %40 = tpu.reciprocal %39 : vector<8x1xf32> -> vector<8x1xf32>
    %41 = vector.broadcast %40 : vector<8x1xf32> to vector<8x8xf32>
    %42 = arith.mulf %37, %41 : vector<8x8xf32>
    %43 = vector.extract_strided_slice %26 {offsets = [0, 0], sizes = [8, 8], strides = [1, 1]} : vector<8x32xf32> to vector<8x8xf32>
    %cst_34 = arith.constant dense<0.000000e+00> : vector<8x8xf32>
    %44 = tpu.matmul %42, %43, %cst_34 {dimension_numbers = #tpu.dot_dimension_numbers<[1], [0], [0], [1], [0, 0, 1, 1], [], []>} : vector<8x8xf32>, vector<8x8xf32>, vector<8x8xf32> -> vector<8x8xf32>
    %c4_i32 = arith.constant 4 : i32
    %45 = arith.muli %arg2, %c4_i32 : i32
    %c0_i32 = arith.constant 0 : i32
    %46 = arith.addi %45, %c0_i32 : i32
    %47 = arith.index_cast %46 : i32 to index
    %48 = memref.load %arg15[%47] : memref<4xf32, #tpu.memory_space<smem>>
    %49 = vector.broadcast %48 : f32 to vector<8x8xf32>
    %50 = arith.mulf %44, %49 : vector<8x8xf32>
    %51 = vector.extract_strided_slice %12 {offsets = [0, 8], sizes = [8, 8], strides = [1, 1]} : vector<8x32xf32> to vector<8x8xf32>
    %52 = vector.extract_strided_slice %19 {offsets = [0, 8], sizes = [8, 8], strides = [1, 1]} : vector<8x32xf32> to vector<8x8xf32>
    %cst_35 = arith.constant dense<0.000000e+00> : vector<8x8xf32>
    %53 = tpu.matmul %51, %52, %cst_35 {dimension_numbers = #tpu.dot_dimension_numbers<[1], [1], [0], [0], [0, 0, 1, 0], [], []>} : vector<8x8xf32>, vector<8x8xf32>, vector<8x8xf32> -> vector<8x8xf32>
    %54 = arith.addf %53, %28 : vector<8x8xf32>
    %cst_36 = arith.constant dense<0xFF800000> : vector<8xf32>
    %55 = vector.multi_reduction <maximumf>, %54, %cst_36 [1] : vector<8x8xf32> to vector<8xf32>
    %56 = vector.shape_cast %55 : vector<8xf32> to vector<8x1xf32>
    %57 = vector.broadcast %56 : vector<8x1xf32> to vector<8x8xf32>
    %58 = arith.subf %54, %57 : vector<8x8xf32>
    %59 = math.exp %58 : vector<8x8xf32>
    %cst_37 = arith.constant dense<0.000000e+00> : vector<8xf32>
    %60 = vector.multi_reduction <add>, %59, %cst_37 [1] : vector<8x8xf32> to vector<8xf32>
    %61 = vector.shape_cast %60 : vector<8xf32> to vector<8x1xf32>
    %62 = tpu.reciprocal %61 : vector<8x1xf32> -> vector<8x1xf32>
    %63 = vector.broadcast %62 : vector<8x1xf32> to vector<8x8xf32>
    %64 = arith.mulf %59, %63 : vector<8x8xf32>
    %65 = vector.extract_strided_slice %26 {offsets = [0, 8], sizes = [8, 8], strides = [1, 1]} : vector<8x32xf32> to vector<8x8xf32>
    %cst_38 = arith.constant dense<0.000000e+00> : vector<8x8xf32>
    %66 = tpu.matmul %64, %65, %cst_38 {dimension_numbers = #tpu.dot_dimension_numbers<[1], [0], [0], [1], [0, 0, 1, 1], [], []>} : vector<8x8xf32>, vector<8x8xf32>, vector<8x8xf32> -> vector<8x8xf32>
    %c4_i32_39 = arith.constant 4 : i32
    %67 = arith.muli %arg2, %c4_i32_39 : i32
    %c1_i32 = arith.constant 1 : i32
    %68 = arith.addi %67, %c1_i32 : i32
    %69 = arith.index_cast %68 : i32 to index
    %70 = memref.load %arg15[%69] : memref<4xf32, #tpu.memory_space<smem>>
    %71 = vector.broadcast %70 : f32 to vector<8x8xf32>
    %72 = arith.mulf %66, %71 : vector<8x8xf32>
    %73 = vector.extract_strided_slice %12 {offsets = [0, 16], sizes = [8, 8], strides = [1, 1]} : vector<8x32xf32> to vector<8x8xf32>
    %74 = vector.extract_strided_slice %19 {offsets = [0, 16], sizes = [8, 8], strides = [1, 1]} : vector<8x32xf32> to vector<8x8xf32>
    %cst_40 = arith.constant dense<0.000000e+00> : vector<8x8xf32>
    %75 = tpu.matmul %73, %74, %cst_40 {dimension_numbers = #tpu.dot_dimension_numbers<[1], [1], [0], [0], [0, 0, 1, 0], [], []>} : vector<8x8xf32>, vector<8x8xf32>, vector<8x8xf32> -> vector<8x8xf32>
    %76 = arith.addf %75, %28 : vector<8x8xf32>
    %cst_41 = arith.constant dense<0xFF800000> : vector<8xf32>
    %77 = vector.multi_reduction <maximumf>, %76, %cst_41 [1] : vector<8x8xf32> to vector<8xf32>
    %78 = vector.shape_cast %77 : vector<8xf32> to vector<8x1xf32>
    %79 = vector.broadcast %78 : vector<8x1xf32> to vector<8x8xf32>
    %80 = arith.subf %76, %79 : vector<8x8xf32>
    %81 = math.exp %80 : vector<8x8xf32>
    %cst_42 = arith.constant dense<0.000000e+00> : vector<8xf32>
    %82 = vector.multi_reduction <add>, %81, %cst_42 [1] : vector<8x8xf32> to vector<8xf32>
    %83 = vector.shape_cast %82 : vector<8xf32> to vector<8x1xf32>
    %84 = tpu.reciprocal %83 : vector<8x1xf32> -> vector<8x1xf32>
    %85 = vector.broadcast %84 : vector<8x1xf32> to vector<8x8xf32>
    %86 = arith.mulf %81, %85 : vector<8x8xf32>
    %87 = vector.extract_strided_slice %26 {offsets = [0, 16], sizes = [8, 8], strides = [1, 1]} : vector<8x32xf32> to vector<8x8xf32>
    %cst_43 = arith.constant dense<0.000000e+00> : vector<8x8xf32>
    %88 = tpu.matmul %86, %87, %cst_43 {dimension_numbers = #tpu.dot_dimension_numbers<[1], [0], [0], [1], [0, 0, 1, 1], [], []>} : vector<8x8xf32>, vector<8x8xf32>, vector<8x8xf32> -> vector<8x8xf32>
    %c4_i32_44 = arith.constant 4 : i32
    %89 = arith.muli %arg2, %c4_i32_44 : i32
    %c2_i32 = arith.constant 2 : i32
    %90 = arith.addi %89, %c2_i32 : i32
    %91 = arith.index_cast %90 : i32 to index
    %92 = memref.load %arg15[%91] : memref<4xf32, #tpu.memory_space<smem>>
    %93 = vector.broadcast %92 : f32 to vector<8x8xf32>
    %94 = arith.mulf %88, %93 : vector<8x8xf32>
    %95 = vector.extract_strided_slice %12 {offsets = [0, 24], sizes = [8, 8], strides = [1, 1]} : vector<8x32xf32> to vector<8x8xf32>
    %96 = vector.extract_strided_slice %19 {offsets = [0, 24], sizes = [8, 8], strides = [1, 1]} : vector<8x32xf32> to vector<8x8xf32>
    %cst_45 = arith.constant dense<0.000000e+00> : vector<8x8xf32>
    %97 = tpu.matmul %95, %96, %cst_45 {dimension_numbers = #tpu.dot_dimension_numbers<[1], [1], [0], [0], [0, 0, 1, 0], [], []>} : vector<8x8xf32>, vector<8x8xf32>, vector<8x8xf32> -> vector<8x8xf32>
    %98 = arith.addf %97, %28 : vector<8x8xf32>
    %cst_46 = arith.constant dense<0xFF800000> : vector<8xf32>
    %99 = vector.multi_reduction <maximumf>, %98, %cst_46 [1] : vector<8x8xf32> to vector<8xf32>
    %100 = vector.shape_cast %99 : vector<8xf32> to vector<8x1xf32>
    %101 = vector.broadcast %100 : vector<8x1xf32> to vector<8x8xf32>
    %102 = arith.subf %98, %101 : vector<8x8xf32>
    %103 = math.exp %102 : vector<8x8xf32>
    %cst_47 = arith.constant dense<0.000000e+00> : vector<8xf32>
    %104 = vector.multi_reduction <add>, %103, %cst_47 [1] : vector<8x8xf32> to vector<8xf32>
    %105 = vector.shape_cast %104 : vector<8xf32> to vector<8x1xf32>
    %106 = tpu.reciprocal %105 : vector<8x1xf32> -> vector<8x1xf32>
    %107 = vector.broadcast %106 : vector<8x1xf32> to vector<8x8xf32>
    %108 = arith.mulf %103, %107 : vector<8x8xf32>
    %109 = vector.extract_strided_slice %26 {offsets = [0, 24], sizes = [8, 8], strides = [1, 1]} : vector<8x32xf32> to vector<8x8xf32>
    %cst_48 = arith.constant dense<0.000000e+00> : vector<8x8xf32>
    %110 = tpu.matmul %108, %109, %cst_48 {dimension_numbers = #tpu.dot_dimension_numbers<[1], [0], [0], [1], [0, 0, 1, 1], [], []>} : vector<8x8xf32>, vector<8x8xf32>, vector<8x8xf32> -> vector<8x8xf32>
    %c4_i32_49 = arith.constant 4 : i32
    %111 = arith.muli %arg2, %c4_i32_49 : i32
    %c3_i32 = arith.constant 3 : i32
    %112 = arith.addi %111, %c3_i32 : i32
    %113 = arith.index_cast %112 : i32 to index
    %114 = memref.load %arg15[%113] : memref<4xf32, #tpu.memory_space<smem>>
    %115 = vector.broadcast %114 : f32 to vector<8x8xf32>
    %116 = arith.mulf %110, %115 : vector<8x8xf32>
    %117 = tpu.concatenate %50, %72, %94, %116 in 1 : vector<8x8xf32>, vector<8x8xf32>, vector<8x8xf32>, vector<8x8xf32> -> vector<8x32xf32>
    %c0_i32_50 = arith.constant 0 : i32
    %118 = arith.cmpi eq, %arg2, %c0_i32_50 : i32
    %119 = arith.extui %118 : i1 to i32
    %c0_i32_51 = arith.constant 0 : i32
    %120 = arith.cmpi ne, %119, %c0_i32_51 : i32
    scf.if %120 {
      %c0_62 = arith.constant 0 : index
      %c0_63 = arith.constant 0 : index
      %130 = vector.load %arg14[%c0_62, %c0_63] : memref<1x32xf32, #tpu.memory_space<vmem>>, vector<1x32xf32>
      %131 = vector.broadcast %130 : vector<1x32xf32> to vector<8x32xf32>
      %132 = arith.addf %1, %131 : vector<8x32xf32>
      %c0_64 = arith.constant 0 : index
      %c0_65 = arith.constant 0 : index
      %c0_66 = arith.constant 0 : index
      %133 = vector.load %arg16[%c0_64, %c0_65, %c0_66] : memref<1x8x32xf32, #tpu.memory_space<vmem>>, vector<1x8x32xf32>
      %134 = vector.shape_cast %133 : vector<1x8x32xf32> to vector<8x32xf32>
      %135 = vector.shape_cast %132 : vector<8x32xf32> to vector<1x8x32xf32>
      tpu.vector_store %arg16[%c0_64, %c0_65, %c0_66], %135 {strides = array<i32>} : memref<1x8x32xf32, #tpu.memory_space<vmem>>, vector<1x8x32xf32>,
    } else {
    }
    %c0_52 = arith.constant 0 : index
    %c0_53 = arith.constant 0 : index
    %c0_54 = arith.constant 0 : index
    %121 = vector.load %arg16[%c0_52, %c0_53, %c0_54] : memref<1x8x32xf32, #tpu.memory_space<vmem>>, vector<1x8x32xf32>
    %122 = vector.shape_cast %121 : vector<1x8x32xf32> to vector<8x32xf32>
    %c0_55 = arith.constant 0 : index
    %c0_56 = arith.constant 0 : index
    %c0_57 = arith.constant 0 : index
    %123 = vector.load %arg13[%c0_55, %c0_56, %c0_57] : memref<1x32x32xf32, #tpu.memory_space<vmem>>, vector<1x32x32xf32>
    %124 = vector.shape_cast %123 : vector<1x32x32xf32> to vector<32x32xf32>
    %cst_58 = arith.constant dense<0.000000e+00> : vector<8x32xf32>
    %125 = tpu.matmul %117, %124, %cst_58 {dimension_numbers = #tpu.dot_dimension_numbers<[1], [0], [0], [1], [0, 0, 1, 1], [], []>} : vector<8x32xf32>, vector<32x32xf32>, vector<8x32xf32> -> vector<8x32xf32>
    %126 = arith.addf %122, %125 : vector<8x32xf32>
    %c0_59 = arith.constant 0 : index
    %c0_60 = arith.constant 0 : index
    %c0_61 = arith.constant 0 : index
    %127 = vector.load %arg16[%c0_59, %c0_60, %c0_61] : memref<1x8x32xf32, #tpu.memory_space<vmem>>, vector<1x8x32xf32>
    %128 = vector.shape_cast %127 : vector<1x8x32xf32> to vector<8x32xf32>
    %129 = vector.shape_cast %126 : vector<8x32xf32> to vector<1x8x32xf32>
    tpu.vector_store %arg16[%c0_59, %c0_60, %c0_61], %129 {strides = array<i32>} : memref<1x8x32xf32, #tpu.memory_space<vmem>>, vector<1x8x32xf32>,
    return
  }
  func.func @transform_0(%arg0: i32, %arg1: i32, %arg2: i32) -> (i32, i32, i32) {
    %c0_i32 = arith.constant 0 : i32
    %c0_i32_0 = arith.constant 0 : i32
    return %arg0, %arg1, %c0_i32 : i32, i32, i32
  }
  func.func @transform_1(%arg0: i32, %arg1: i32, %arg2: i32) -> (i32, i32, i32) {
    %c0_i32 = arith.constant 0 : i32
    %c0_i32_0 = arith.constant 0 : i32
    %c0_i32_1 = arith.constant 0 : i32
    return %arg0, %c0_i32, %c0_i32_0 : i32, i32, i32
  }
  func.func @transform_2(%arg0: i32, %arg1: i32, %arg2: i32) -> (i32, i32, i32) {
    %c0_i32 = arith.constant 0 : i32
    %c0_i32_0 = arith.constant 0 : i32
    %c0_i32_1 = arith.constant 0 : i32
    return %arg0, %c0_i32, %c0_i32_0 : i32, i32, i32
  }
  func.func @transform_3(%arg0: i32, %arg1: i32, %arg2: i32) -> (i32, i32, i32) {
    %c0_i32 = arith.constant 0 : i32
    %c0_i32_0 = arith.constant 0 : i32
    return %arg0, %arg1, %c0_i32 : i32, i32, i32
  }
  func.func @transform_4(%arg0: i32, %arg1: i32, %arg2: i32) -> (i32, i32, i32) {
    %c0_i32 = arith.constant 0 : i32
    %c0_i32_0 = arith.constant 0 : i32
    %c0_i32_1 = arith.constant 0 : i32
    return %arg2, %c0_i32, %c0_i32_0 : i32, i32, i32
  }
  func.func @transform_5(%arg0: i32, %arg1: i32, %arg2: i32) -> (i32, i32, i32) {
    %c0_i32 = arith.constant 0 : i32
    %c0_i32_0 = arith.constant 0 : i32
    %c0_i32_1 = arith.constant 0 : i32
    return %arg2, %c0_i32, %c0_i32_0 : i32, i32, i32
  }
  func.func @transform_6(%arg0: i32, %arg1: i32, %arg2: i32) -> (i32, i32, i32) {
    %c0_i32 = arith.constant 0 : i32
    %c0_i32_0 = arith.constant 0 : i32
    %c0_i32_1 = arith.constant 0 : i32
    return %arg2, %c0_i32, %c0_i32_0 : i32, i32, i32
  }
  func.func @transform_7(%arg0: i32, %arg1: i32, %arg2: i32) -> (i32, i32, i32) {
    %c0_i32 = arith.constant 0 : i32
    %c0_i32_0 = arith.constant 0 : i32
    %c0_i32_1 = arith.constant 0 : i32
    return %arg2, %c0_i32, %c0_i32_0 : i32, i32, i32
  }
  func.func @transform_8(%arg0: i32, %arg1: i32, %arg2: i32) -> (i32, i32, i32) {
    %c0_i32 = arith.constant 0 : i32
    %c0_i32_0 = arith.constant 0 : i32
    %c0_i32_1 = arith.constant 0 : i32
    return %arg2, %c0_i32, %c0_i32_0 : i32, i32, i32
  }
  func.func @transform_9(%arg0: i32, %arg1: i32, %arg2: i32) -> (i32, i32, i32) {
    %c0_i32 = arith.constant 0 : i32
    %c0_i32_0 = arith.constant 0 : i32
    %c0_i32_1 = arith.constant 0 : i32
    return %arg2, %c0_i32, %c0_i32_0 : i32, i32, i32
  }
  func.func @transform_10(%arg0: i32, %arg1: i32, %arg2: i32) -> (i32, i32, i32) {
    %c0_i32 = arith.constant 0 : i32
    %c0_i32_0 = arith.constant 0 : i32
    %c0_i32_1 = arith.constant 0 : i32
    return %arg2, %c0_i32, %c0_i32_0 : i32, i32, i32
  }
  func.func @transform_11(%arg0: i32, %arg1: i32, %arg2: i32) -> (i32, i32) {
    %c0_i32 = arith.constant 0 : i32
    %c0_i32_0 = arith.constant 0 : i32
    %c0_i32_1 = arith.constant 0 : i32
    return %c0_i32, %c0_i32_0 : i32, i32
  }
  func.func @transform_12(%arg0: i32, %arg1: i32, %arg2: i32) -> i32 {
    %c0_i32 = arith.constant 0 : i32
    %c0_i32_0 = arith.constant 0 : i32
    return %c0_i32 : i32
  }
  func.func @transform_13(%arg0: i32, %arg1: i32, %arg2: i32) -> (i32, i32, i32) {
    %c0_i32 = arith.constant 0 : i32
    %c0_i32_0 = arith.constant 0 : i32
    return %arg0, %arg1, %c0_i32 : i32, i32, i32
  }
}

</mosaic_0001>

<bundles_post_ra>
// kernel: tpu_custom_call.1
= control target key start
LH: loop header
LB: loop body
LE: loop exit
PB: predicated region body
PF: predicated region fallthrough
CT: control target
= control target key end

     0   :  { %s3324_s0 = inlined_call_operand.hbm [shape: f32[2,8,32], index: 0, kind: input, shape index: {}]   ;;  %s3325_s1 = inlined_call_operand.hbm [shape: f32[2,8,32], index: 1, kind: input, shape index: {}]   ;;  %s3326_s2 = inlined_call_operand.hbm [shape: f32[2,8,32], index: 2, kind: input, shape index: {}]   ;;  %s3327_s3 = inlined_call_operand.hbm [shape: f32[2,8,8], index: 3, kind: input, shape index: {}]   ;;  %s3328_s4 = inlined_call_operand.hbm [shape: f32[1,32,32], index: 4, kind: input, shape index: {}]   ;;  %s3329_s5 = inlined_call_operand.vmem [shape: f32[1,1,32], index: 5, kind: input, shape index: {}]   ;;  %s3330_s6 = inlined_call_operand.hbm [shape: f32[1,32,32], index: 6, kind: input, shape index: {}]   ;;  %s3331_s7 = inlined_call_operand.vmem [shape: f32[1,1,32], index: 7, kind: input, shape index: {}]   ;;  %s3332_s8 = inlined_call_operand.hbm [shape: f32[1,32,32], index: 8, kind: input, shape index: {}]   ;;  %s3333_s9 = inlined_call_operand.vmem [shape: f32[1,1,32], index: 9, kind: input, shape index: {}]   ;;  %s3334_s10 = inlined_call_operand.vmem [shape: f32[1,32,32], index: 10, kind: input, shape index: {}]   ;;  %s3335_s11 = inlined_call_operand.vmem [shape: f32[1,32], index: 11, kind: input, shape index: {}]   ;;  %s3336_s12 = inlined_call_operand.vmem [shape: f32[4], index: 12, kind: input, shape index: {}]   ;;  %s3337_s13 = inlined_call_operand.hbm [shape: f32[2,8,32], index: 13, kind: output, shape index: {}]  }
   0x1   :  { %3360 = sst [smem:[#allocation31_spill]] %s3325_s1 }
   0x2   :  { %3361 = sst [smem:[#allocation32_spill]] %s3328_s4 }
   0x3   :  { %3362 = sst [smem:[#allocation33_spill]] %s3329_s5 }
   0x4   :  { %3363 = sst [smem:[#allocation34_spill]] %s3330_s6 }
   0x5   :  { %3364 = sst [smem:[#allocation35_spill]] %s3333_s9 }
   0x6   :  { %3365 = sst [smem:[#allocation36_spill]] %s3334_s10 }
   0x7   :  { %3366 = sst [smem:[#allocation37_spill]] %s3335_s11 }
   0x8   :  { %3367 = sst [smem:[#allocation38_spill]] %s3337_s13 }
   0x9   :  { %18 = vsyncpa [#allocation3], 0 }
   0xa   :  { %20 = vsyncpa [#allocation3 + $0x1], 0 }
   0xb   :  { %21 = vsyncpa [#allocation7], 0 }
   0xc   :  { %23 = vsyncpa [#allocation7 + $0x1], 0 }
   0xd   :  { %24 = vsyncpa [#allocation10], 0 }
   0xe   :  { %26 = vsyncpa [#allocation10 + $0x1], 0 }
   0xf   :  { %27 = vsyncpa [#allocation13], 0 }
  0x10   :  { %28 = vsyncpa [#allocation5], 0 }
  0x11   :  { %29 = vsyncpa [#allocation4], 0 }
  0x12   :  { %31 = vsyncpa [#allocation4 + $0x1], 0  ;;  %s2795_s25 = smov 0   ;;  %s2797_s26 = smov 0  }
  0x13   :  { %s2799_s27 = smov 0   ;;  %s2801_s28 = smov 0  }
  0x14   :  { %s2803_s29 = smov 0   ;;  %s2805_s30 = smov 0  }
  0x15 LB: > { %3368 = sst [smem:[#allocation24_spill]] %s2683_s25  ;;  %s2826_s14 = sadd.s32 4294967295, %s2703_s30   ;;  %s2703_s30 = sphi %s2805_s30, %s37_s30   ;;  %s2699_s29 = sphi %s2803_s29, %s3418_s29   ;;  %s2695_s28 = sphi %s2801_s28, %s3417_s28   ;;  %s2691_s27 = sphi %s2799_s27, %s3421_s27   ;;  %s2687_s26 = sphi %s2797_s26, %s3420_s26   ;;  %s2683_s25 = sphi %s2795_s25, %s3419_s25  }
  0x16   : > { %3369 = sst [smem:[#allocation25_spill]] %s2695_s28  ;;  %s2037_s15 = sadd.s32 4294967294, %s2703_s30  }
  0x17   : > { %3370 = sst [smem:[#allocation26_spill]] %s2699_s29  ;;  %p78_p0 = scmp.ne.s32.totalorder %s2687_s26, %s2683_s25 }
  0x18   : > { %p3341_p1 = scmp.eq.s32.totalorder %s2826_s14, 0  ;;  %p414_p3 = scmp.eq.s32.totalorder %s2037_s15, 1 }
  0x19   : > { %p2038_p5 = scmp.ge.s32.totalorder %s2703_s30, 1  ;;  %p421_p7 = scmp.lt.s32.totalorder %s2703_s30, 3 }
  0x1a   : > { %p2835_p4 = por %p3341_p1, %p78_p0  ;;  %p2840_p6 = por %p414_p3, %p78_p0 }
  0x1b   : > { %p2845_p8 = pnand %p2038_p5, %p421_p7  ;;  %s2705_s19 = smov [#allocation11]  }
  0x1c   : > { %s3371_s16 = scalar_select %p2835_p4, 1, 0 }
  0x1d   : > { %s3372_s17 = scalar_select %p2840_p6, 1, 0 }
  0x1e   : > { %s3374_s18 = scalar_select %p2845_p8, 1, 0 }
  0x1f   : > { %3373 = sst [smem:[#allocation27_spill]] %s3372_s17  ;;  %s436_s20 = sshll.u32 %s2705_s19, 4  ;;  %s2849_s20 = int_to_ptr.vmem [resolvable:$true] %s436_s20 }
  0x20   : > { %p2263_p9 = pneg %p2845_p8  ;;  %s2706_s22 = smov [#allocation12]  }
  0x21   : > { %s458_s23 = sshll.u32 %s2706_s22, 4  ;;  %s3376_s4 = sld [smem:[#allocation32_spill]]  ;;  %s2860_s23 = int_to_ptr.vmem [resolvable:$true] %s458_s23 }
  0x22   : > { %p2856_p11 = pnand %p2263_p9, %p3341_p1 }
  0x24   : > { %s3375_s21 = scalar_select %p2856_p11, 1, 0 }
  0x25   : > { %p2870_p13 = pneg %p2856_p11 }
  0x27   : > { %s2382_s17 = scalar_lea.hbm %s3376_s4, 512 }
  0x28   : > { %p2383_p12 = scmp.ne.s32.totalorder %s3376_s4, %s2382_s17  ;;  %p2389_p5 = scmp.lt.u32.totalorder %s2382_s17, %s3376_s4 }
  0x29   : > { %s3377_s13 = scalar_select %p2870_p13, 1, 0 }
  0x2a   : > { %p2385_p0 = pnand %p2870_p13, %p2383_p12 }
  0x2c   : > { %p2386_p3 = pneg %p2385_p0 }
  0x2e   : > { %p2391_p7 = pnand %p2389_p5, %p2386_p3 }
  0x30   : > { %2394 = shalt.err (!%p2391_p7)
}
  0x31   : > { %s2395_s25 = scalar_lea.vmem %s2849_s20, 512  ;;  %p2403_p2 = scmp.lt.s32.totalorder %s2849_s20, %s2849_s20 }
  0x32   : > { %p2396_p9 = scmp.ne.s32.totalorder %s2849_s20, %s2395_s25  ;;  %p2404_p6 = scmp.lt.s32.totalorder %s2395_s25, %s2395_s25 }
  0x34   : > { %p2398_p10 = pnand %p2396_p9, %p2870_p13  ;;  %p2405_p12 = por %p2404_p6, %p2403_p2 }
  0x36   : > { %p2399_p1 = pneg %p2398_p10 }
  0x38   : > { %p2406_p0 = pnand %p2405_p12, %p2399_p1 }
  0x3a   : > { %2409 = shalt.err (!%p2406_p0)
}
  0x3b   : > { %s3343_s24 = smov 128   ;;  %s3344_s28 = smov 8  }
  0x3c   : > { %2266 = dma.hbm_to_vmem [thread:$0]  (!%p2856_p11), %s3376_s4, 512, %s2849_s20, [#allocation10], %s3343_s24, %s3343_s24, %s3344_s28  }
  0x3d   : > { %s3378_s6 = sld [smem:[#allocation34_spill]] }
  0x43   : > { %s2410_s25 = scalar_lea.hbm %s3378_s6, 512 }
  0x44   : > { %p2411_p1 = scmp.ne.s32.totalorder %s3378_s6, %s2410_s25  ;;  %p2417_p10 = scmp.lt.u32.totalorder %s2410_s25, %s3378_s6 }
  0x46   : > { %p2413_p2 = pnand %p2411_p1, %p2870_p13 }
  0x48   : > { %p2414_p6 = pneg %p2413_p2 }
  0x4a   : > { %p2419_p3 = pnand %p2417_p10, %p2414_p6 }
  0x4c   : > { %2422 = shalt.err (!%p2419_p3)
}
  0x4d   : > { %s2423_s20 = scalar_lea.vmem %s2860_s23, 512  ;;  %p2431_p12 = scmp.lt.s32.totalorder %s2860_s23, %s2860_s23 }
  0x4e   : > { %p2424_p5 = scmp.ne.s32.totalorder %s2860_s23, %s2423_s20  ;;  %p2432_p0 = scmp.lt.s32.totalorder %s2423_s20, %s2423_s20 }
  0x50   : > { %p2426_p7 = pnand %p2424_p5, %p2870_p13  ;;  %p2433_p1 = por %p2432_p0, %p2431_p12 }
  0x52   : > { %p2427_p9 = pneg %p2426_p7 }
  0x54   : > { %p2434_p2 = pnand %p2433_p1, %p2427_p9 }
  0x56   : > { %2437 = shalt.err (!%p2434_p2)
}
  0x57   : > { %2269 = dma.hbm_to_vmem [thread:$0]  (!%p2856_p11), %s3378_s6, 512, %s2860_s23, [#allocation13], %s3343_s24, %s3343_s24, %s3344_s28  }
  0x58   : > { %s56_s10 = sadd.s32 1, %s2699_s29  ;;  %s65_s11 = sadd.s32 1, %s2691_s27 }
  0x59   : > { %p58_p6 = scmp.ge.s32.totalorder %s56_s10, 2  ;;  %p72_p10 = scmp.ne.s32.totalorder %s2691_s27, %s2687_s26 }
  0x5a   : > { %p73_p3 = scmp.eq.s32.totalorder %s2703_s30, 0  ;;  %p2297_p5 = scmp.lt.s32.totalorder %s2703_s30, 2 }
  0x5b   : > { %s3423_s10 = smov (%p58_p6, %s56_s10), 0  ;;  %p3380_p9 = scmp.eq.s32.totalorder %s2826_s14, 1 }
  0x5c   : > { %3379 = sst [smem:[#allocation28_spill]] %s3423_s10  ;;  %p74_p7 = por %p73_p3, %p72_p10 }
  0x5d   : > { %p2930_p12 = por %p3380_p9, %p72_p10  ;;  %s60_s15 = ssub.s32 %s2699_s29, %s3423_s10 }
  0x5e   : > { %s3345_s23 = sand.u32 1, %s2691_s27   ;;  %p63_p0 = scmp.eq.s32.totalorder %s60_s15, 0 }
  0x5f   : > { %s3381_s17 = scalar_select %p2930_p12, 1, 0 }
  0x60   : > { %s2939_s19 = sshll.u32 %s3345_s23, 3  ;;  %s2942_s22 = sshll.u32 %s2699_s29, 7 }
  0x61   : > { %3382 = sst [smem:[#allocation29_spill]] %s3381_s17  ;;  %p2944_p1 = pnand %p2297_p5, %p74_p7 }
  0x62   : > { %s2949_s20 = scalar_select %p63_p0, %s2691_s27, %s65_s11  }
  0x63   : > { %s3383_s25 = scalar_select %p2944_p1, 1, 0 }
  0x64   : > { %3384 = sst [smem:[#allocation30_spill]] %s2949_s20  ;;  %s3350_s5 = sand.u32 1, %s2703_s30  }
  0x65   : > { %s3385_s1 = sld [smem:[#allocation31_spill]]  ;;  %s545_s15 = scalar_lea.vmem [#allocation6], %s2939_s19 }
  0x66   : > { %s552_s23 = sshll.u32 %s545_s15, 4  ;;  %s2963_s4 = scalar_lea.sflag [#allocation7], %s3350_s5  ;;  %s2959_s23 = int_to_ptr.vmem [resolvable:$true] %s552_s23 }
  0x67   : > { %p2969_p6 = pneg %p2944_p1 }
  0x6b   : > { %s2956_s28 = scalar_lea.hbm %s3385_s1, %s2942_s22  ;;  %s2443_s15 = scalar_lea.hbm %s3385_s1, 256 }
  0x6c   : > { %s2438_s6 = scalar_lea.hbm %s2956_s28, 128  ;;  %p2444_p5 = scmp.lt.u32.totalorder %s2956_s28, %s3385_s1 }
  0x6d   : > { %p2439_p2 = scmp.ne.s32.totalorder %s2956_s28, %s2438_s6  ;;  %p2445_p7 = scmp.lt.u32.totalorder %s2443_s15, %s2438_s6 }
  0x6e   : > { %p2447_p0 = scmp.lt.u32.totalorder %s2438_s6, %s2956_s28 }
  0x6f   : > { %p2441_p10 = pnand %p2969_p6, %p2439_p2  ;;  %p2446_p9 = por %p2445_p7, %p2444_p5 }
  0x71   : > { %p2442_p3 = pneg %p2441_p10  ;;  %p2448_p12 = por %p2447_p0, %p2446_p9 }
  0x73   : > { %p2449_p4 = pnand %p2448_p12, %p2442_p3 }
  0x75   : > { %2452 = shalt.err (!%p2449_p4)
}
  0x76   : > { %s2453_s5 = scalar_lea.vmem %s2959_s23, 128  ;;  %s2709_s24 = smov [#allocation6]  }
  0x77   : > { %p2454_p2 = scmp.ne.s32.totalorder %s2959_s23, %s2453_s5  ;;  %s2458_s9 = sshll.u32 %s2709_s24, 4  ;;  %s2459_s9 = int_to_ptr.vmem [resolvable:$false] %s2458_s9 }
  0x78   : > { %s2460_s29 = scalar_lea.vmem %s2459_s9, 256  ;;  %p2461_p11 = scmp.lt.s32.totalorder %s2959_s23, %s2459_s9 }
  0x79   : > { %p2456_p10 = pnand %p2454_p2, %p2969_p6  ;;  %p2462_p13 = scmp.lt.s32.totalorder %s2460_s29, %s2453_s5 }
  0x7b   : > { %p2457_p8 = pneg %p2456_p10  ;;  %p2463_p5 = por %p2462_p13, %p2461_p11 }
  0x7d   : > { %p2464_p7 = pnand %p2463_p5, %p2457_p8 }
  0x7f   : > { %2467 = shalt.err (!%p2464_p7)
}
  0x80   : > { %2282 = dma.hbm_to_vmem [thread:$0]  (!%p2944_p1), %s2956_s28, 128, %s2959_s23, %s2963_s4  }
  0x81   : > { %s511_s15 = sshll.u32 %s3336_s12, 4  ;;  %s2710_s1 = smov [#allocation14]   ;;  %s2996_s15 = int_to_ptr.vmem [resolvable:$true] %s511_s15 }
  0x82   : > { %s480_s24 = sshll.u32 %s2710_s1, 4  ;;  %s2468_s29 = scalar_lea.hbm %s3332_s8, 512  ;;  %s481_s24 = int_to_ptr.vmem [resolvable:$true] %s480_s24 }
  0x83   : > { %p2469_p4 = scmp.ne.s32.totalorder %s3332_s8, %s2468_s29  ;;  %p3387_p8 = scmp.ne.s32.totalorder %s3377_s13, 0 }
  0x84   : > { %p2475_p12 = scmp.lt.u32.totalorder %s2468_s29, %s3332_s8 }
  0x85   : > { %p2471_p11 = pnand %p2469_p4, %p3387_p8 }
  0x87   : > { %p2472_p13 = pneg %p2471_p11 }
  0x89   : > { %p2477_p3 = pnand %p2475_p12, %p2472_p13 }
  0x8b   : > { %2480 = shalt.err (!%p2477_p3)
}
  0x8c   : > { %s2481_s1 = scalar_lea.vmem %s481_s24, 512  ;;  %p2489_p10 = scmp.lt.s32.totalorder %s481_s24, %s481_s24 }
  0x8d   : > { %p2482_p9 = scmp.ne.s32.totalorder %s481_s24, %s2481_s1  ;;  %p2490_p5 = scmp.lt.s32.totalorder %s2481_s1, %s2481_s1 }
  0x8f   : > { %p2484_p0 = pnand %p2482_p9, %p3387_p8  ;;  %p2491_p7 = por %p2490_p5, %p2489_p10 }
  0x91   : > { %p2485_p2 = pneg %p2484_p0 }
  0x93   : > { %p2492_p1 = pnand %p2491_p7, %p2485_p2 }
  0x95   : > { %2495 = shalt.err (!%p2492_p1)
}
  0x96   : > { %p3388_p4 = scmp.ne.s32.totalorder %s3375_s21, 0  ;;  %s3389_s17 = smov 8  }
  0x97   : > { %s3390_s20 = smov 128   ;;  %s2496_s5 = scalar_lea.vmem %s2996_s15, 16 }
  0x98   : > { %2272 = dma.hbm_to_vmem [thread:$0]  (!%p3388_p4), %s3332_s8, 512, %s481_s24, [#allocation13], %s3390_s20, %s3390_s20, %s3389_s17  }
  0x99   : > { %p2497_p11 = scmp.ne.s32.totalorder %s2996_s15, %s2496_s5  ;;  %p2504_p1 = scmp.lt.s32.totalorder %s2996_s15, %s2996_s15 }
  0x9a   : > { %p2505_p3 = scmp.lt.s32.totalorder %s2496_s5, %s2496_s5 }
  0x9b   : > { %p2499_p13 = pnand %p2497_p11, %p3387_p8 }
  0x9c   : > { %p2506_p9 = por %p2505_p3, %p2504_p1 }
  0x9d   : > { %p2500_p12 = pneg %p2499_p13 }
  0x9f   : > { %p2507_p0 = pnand %p2506_p9, %p2500_p12 }
  0xa1   : > { %2510 = shalt.err (!%p2507_p0)
}
  0xa2   : > { %s2711_s9 = smov [#allocation15]   ;;  %s3032_s13 = scalar_lea.hbm %s3324_s0, %s2942_s22 }
  0xa3   : > { %2275 = dma.vmem_to_smem (!%p3388_p4), %s2996_s15, 16, %s2711_s9, [#allocation5]  }
  0xa4   : > { %s526_s28 = scalar_lea.vmem [#allocation2], %s2939_s19  ;;  %s3391_s1 = sand.u32 1, %s2691_s27  }
  0xa5   : > { %s534_s23 = sshll.u32 %s526_s28, 4  ;;  %s523_s21 = scalar_lea.sflag [#allocation3], %s3391_s1  ;;  %s535_s23 = int_to_ptr.vmem [resolvable:$true] %s534_s23 }
  0xa6   : > { %s2511_s17 = scalar_lea.hbm %s3032_s13, 128  ;;  %s2516_s6 = scalar_lea.hbm %s3324_s0, 256 }
  0xa7   : > { %p2512_p8 = scmp.ne.s32.totalorder %s3032_s13, %s2511_s17  ;;  %p2517_p5 = scmp.lt.u32.totalorder %s3032_s13, %s3324_s0 }
  0xa8   : > { %p2518_p7 = scmp.lt.u32.totalorder %s2516_s6, %s2511_s17  ;;  %p2520_p11 = scmp.lt.u32.totalorder %s2511_s17, %s3032_s13 }
  0xa9   : > { %p2514_p2 = pnand %p2512_p8, %p2969_p6 }
  0xaa   : > { %p2519_p4 = por %p2518_p7, %p2517_p5 }
  0xab   : > { %p2515_p10 = pneg %p2514_p2 }
  0xac   : > { %p2521_p13 = por %p2520_p11, %p2519_p4 }
  0xae   : > { %p2522_p12 = pnand %p2521_p13, %p2515_p10 }
  0xb0   : > { %2525 = shalt.err (!%p2522_p12)
}
  0xb1   : > { %s2526_s9 = scalar_lea.vmem %s535_s23, 128  ;;  %s2712_s24 = smov [#allocation2]  }
  0xb2   : > { %p2527_p1 = scmp.ne.s32.totalorder %s535_s23, %s2526_s9  ;;  %s2531_s29 = sshll.u32 %s2712_s24, 4  ;;  %s2532_s29 = int_to_ptr.vmem [resolvable:$false] %s2531_s29 }
  0xb3   : > { %s2533_s28 = scalar_lea.vmem %s2532_s29, 256  ;;  %p2534_p0 = scmp.lt.s32.totalorder %s535_s23, %s2532_s29 }
  0xb4   : > { %p2529_p3 = pnand %p2527_p1, %p2969_p6  ;;  %p2535_p8 = scmp.lt.s32.totalorder %s2533_s28, %s2526_s9 }
  0xb6   : > { %p2530_p9 = pneg %p2529_p3  ;;  %p2536_p2 = por %p2535_p8, %p2534_p0 }
  0xb8   : > { %p2537_p5 = pnand %p2536_p2, %p2530_p9 }
  0xba   : > { %2540 = shalt.err (!%p2537_p5)
}
  0xbb   : > { %p3392_p7 = scmp.ne.s32.totalorder %s3383_s25, 0  ;;  %s3058_s15 = scalar_lea.hbm %s3326_s2, %s2942_s22 }
  0xbc   : > { %s563_s20 = scalar_lea.vmem [#allocation8], %s2939_s19  ;;  %s2541_s10 = scalar_lea.hbm %s3058_s15, 128 }
  0xbd   : > { %2279 = dma.hbm_to_vmem [thread:$0]  (!%p3392_p7), %s3032_s13, 128, %s535_s23, %s523_s21  }
  0xbe   : > { %s570_s6 = sshll.u32 %s563_s20, 4  ;;  %p2542_p10 = scmp.ne.s32.totalorder %s3058_s15, %s2541_s10  ;;  %s571_s6 = int_to_ptr.vmem [resolvable:$true] %s570_s6 }
  0xbf   : > { %s2546_s13 = scalar_lea.hbm %s3326_s2, 256  ;;  %p2547_p13 = scmp.lt.u32.totalorder %s3058_s15, %s3326_s2 }
  0xc0   : > { %p2544_p4 = pnand %p2542_p10, %p2969_p6  ;;  %p2548_p12 = scmp.lt.u32.totalorder %s2546_s13, %s2541_s10 }
  0xc1   : > { %p2550_p3 = scmp.lt.u32.totalorder %s2541_s10, %s3058_s15 }
  0xc2   : > { %p2545_p11 = pneg %p2544_p4  ;;  %p2549_p1 = por %p2548_p12, %p2547_p13 }
  0xc4   : > { %p2551_p9 = por %p2550_p3, %p2549_p1 }
  0xc6   : > { %p2552_p0 = pnand %p2551_p9, %p2545_p11 }
  0xc8   : > { %2555 = shalt.err (!%p2552_p0)
}
  0xc9   : > { %s2556_s24 = scalar_lea.vmem %s571_s6, 128  ;;  %s2713_s29 = smov [#allocation8]  }
  0xca   : > { %p2557_p8 = scmp.ne.s32.totalorder %s571_s6, %s2556_s24  ;;  %s2561_s28 = sshll.u32 %s2713_s29, 4  ;;  %s2562_s28 = int_to_ptr.vmem [resolvable:$false] %s2561_s28 }
  0xcb   : > { %s2563_s1 = scalar_lea.vmem %s2562_s28, 256  ;;  %p2564_p10 = scmp.lt.s32.totalorder %s571_s6, %s2562_s28 }
  0xcc   : > { %p2559_p2 = pnand %p2557_p8, %p2969_p6  ;;  %p2565_p4 = scmp.lt.s32.totalorder %s2563_s1, %s2556_s24 }
  0xce   : > { %p2560_p5 = pneg %p2559_p2  ;;  %p2566_p7 = por %p2565_p4, %p2564_p10 }
  0xd0   : > { %p2567_p12 = pnand %p2566_p7, %p2560_p5 }
  0xd2   : > { %2570 = shalt.err (!%p2567_p12)
}
  0xd3   : > { %p3393_p13 = scmp.ne.s32.totalorder %s3383_s25, 0  ;;  %s3083_s10 = scalar_lea.hbm %s3327_s3, %s2942_s22 }
  0xd4   : > { %s581_s5 = scalar_lea.vmem [#allocation9], %s2939_s19  ;;  %s3394_s13 = sand.u32 1, %s2703_s30  }
  0xd5   : > { %2285 = dma.hbm_to_vmem [thread:$0]  (!%p3393_p13), %s3058_s15, 128, %s571_s6, %s2963_s4  }
  0xd6   : > { %s589_s9 = sshll.u32 %s581_s5, 4  ;;  %s578_s23 = scalar_lea.sflag [#allocation10], %s3394_s13  ;;  %s590_s9 = int_to_ptr.vmem [resolvable:$true] %s589_s9 }
  0xd7   : > { %s2571_s21 = scalar_lea.hbm %s3083_s10, 128  ;;  %s2576_s6 = scalar_lea.hbm %s3327_s3, 256 }
  0xd8   : > { %p2572_p7 = scmp.ne.s32.totalorder %s3083_s10, %s2571_s21  ;;  %p2577_p3 = scmp.lt.u32.totalorder %s3083_s10, %s3327_s3 }
  0xd9   : > { %p2578_p9 = scmp.lt.u32.totalorder %s2576_s6, %s2571_s21  ;;  %p2580_p8 = scmp.lt.u32.totalorder %s2571_s21, %s3083_s10 }
  0xda   : > { %p2574_p11 = pnand %p2572_p7, %p2969_p6 }
  0xdb   : > { %p2579_p0 = por %p2578_p9, %p2577_p3 }
  0xdc   : > { %p2575_p1 = pneg %p2574_p11 }
  0xdd   : > { %p2581_p2 = por %p2580_p8, %p2579_p0 }
  0xdf   : > { %p2582_p5 = pnand %p2581_p2, %p2575_p1 }
  0xe1   : > { %2585 = shalt.err (!%p2582_p5)
}
  0xe2   : > { %s2586_s19 = scalar_lea.vmem %s590_s9, 128  ;;  %s2714_s29 = smov [#allocation9]  }
  0xe3   : > { %p2587_p10 = scmp.ne.s32.totalorder %s590_s9, %s2586_s19  ;;  %s2591_s28 = sshll.u32 %s2714_s29, 4  ;;  %s2592_s28 = int_to_ptr.vmem [resolvable:$false] %s2591_s28 }
  0xe4   : > { %s2593_s1 = scalar_lea.vmem %s2592_s28, 256  ;;  %p2594_p7 = scmp.lt.s32.totalorder %s590_s9, %s2592_s28 }
  0xe5   : > { %p2589_p4 = pnand %p2587_p10, %p2969_p6  ;;  %p2595_p11 = scmp.lt.s32.totalorder %s2593_s1, %s2586_s19 }
  0xe7   : > { %p2590_p12 = pneg %p2589_p4  ;;  %p2596_p13 = por %p2595_p11, %p2594_p7 }
  0xe9   : > { %p2597_p3 = pnand %p2596_p13, %p2590_p12 }
  0xeb   : > { %2600 = shalt.err (!%p2597_p3)
}
  0xec   : > { %p3395_p9 = scmp.ne.s32.totalorder %s3383_s25, 0  ;;  %p3396_p1 = scmp.ne.s32.totalorder %s3374_s18, 0 }
  0xed   : > { %s3108_s11 = sand.u32 (!%p3396_p1), 1, %s2687_s26   ;;  %p3397_p6 = scmp.ne.s32.totalorder (!%p3396_p1), %s3371_s16, 0 }
  0xee   : > { %2288 = dma.hbm_to_vmem [thread:$0]  (!%p3395_p9), %s3083_s10, 128, %s590_s9, %s578_s23  }
  0xef   : > { %598 = sbr.rel (%p3396_p1) target bundleno = 2175 (0x87f), region = 72  ;;  %s3111_s17 = sshll.u32 (!%p3396_p1), %s3108_s11, 3 }
  0xf0   : > { %s601_s20 = scalar_lea.sflag (!%p3396_p1), [#allocation3], %s3108_s11  ;;  %s604_s5 = scalar_lea.vmem (!%p3396_p1), [#allocation2], %s3111_s17 }
  0xf6   : > { %2654 = dma.done.wait (%p3397_p6), %s601_s20, 128  }
  0xf7   : > { %2656 = vsyncadd (%p3397_p6), %s601_s20, 4294967168  ;;  %s609_s18 = sand.u32 1, %s2826_s14   ;;  %s613_s10 = scalar_lea.vmem [#allocation6], %s3111_s17 }
  0xf8   : > { %s610_s25 = scalar_lea.sflag [#allocation7], %s609_s18 }
  0xf9   : > { %2658 = dma.done.wait (%p3397_p6), %s610_s25, 256  }
  0xfa   : > { %2660 = vsyncadd (%p3397_p6), %s610_s25, 4294967040  ;;  %s622_s9 = scalar_lea.vmem [#allocation8], %s3111_s17  ;;  %s628_s13 = scalar_lea.sflag [#allocation10], %s609_s18 }
  0xfb   : > { %s631_s23 = scalar_lea.vmem [#allocation9], %s3111_s17 }
  0xfc   : > { %2662 = dma.done.wait (%p3397_p6), %s628_s13, 128  }
  0xfd   : > { %2664 = vsyncadd (%p3397_p6), %s628_s13, 4294967168  ;;  %p3398_p13 = scmp.eq.s32.totalorder %s2826_s14, 0 }
  0xff   : > { %2666 = dma.done.wait (%p3398_p13), [#allocation10], 512   ;;  %p3399_p0 = pmov %p3398_p13 }
 0x101   : > { %2668 = vsyncadd (%p3399_p0), [#allocation10], 4294966784  ;;  %p3400_p8 = pmov %p3399_p0 }
 0x102   : > { %p3401_p2 = pmov %p3399_p0 }
 0x103   : > { %2670 = dma.done.wait (%p3400_p8), [#allocation13], 1024  }
 0x104   : > { %2672 = vsyncadd (%p3401_p2), [#allocation13], 4294966272  ;;  %p3402_p5 = pmov %p3399_p0 }
 0x105   : > { %p3403_p10 = pmov %p3399_p0 }
 0x106   : > { %2674 = dma.done.wait (%p3402_p5), [#allocation5], 16  }
 0x107   : > { %2676 = vsyncadd (%p3403_p10), [#allocation5], 4294967280 }
 0x108   : > { %652 = sfence }
 0x109   : > { %v822_v0 = vld [vmem:[#allocation12] sm:$0xff]  ;;  %v823_v1 = vld [vmem:[#allocation12 + $0x8] sm:$0xff]  ;;  %v2715_v3 = vmov 0.0|0.0   ;;  %v824_v6 = vld [vmem:[#allocation12 + $0x10] sm:$0xff]  ;;  %vm2716_vm0 = vmmov 0   ;;  %v2717_v9 = vmov 0.0  }
 0x10a   : > { %v737_v2 = vld [vmem:[#allocation11] sm:$0xff]  ;;  %2219 = vmatprep.subr.bf16.mxu1 %v2715_v3  ;;  %v2220_v4 = vpack.c.bf16 %v823_v1, %v822_v0  ;;  %2213 = vmatprep.subr.bf16.mxu0 %v2715_v3  ;;  %v738_v5 = vld [vmem:[#allocation11 + $0x8] sm:$0xff]  ;;  %v825_v7 = vld [vmem:[#allocation12 + $0x18] sm:$0xff]  ;;  %vm748_vm1 = vcmask 261120   ;;  %s3404_s15 = sld [smem:[#allocation33_spill]]  ;;  %vm991_vm2 = vcmask 64512  }
 0x10b   : > { %v2214_v8 = vpack.c.bf16 %v738_v5, %v737_v2  ;;  %2148 = vmatprep.mubr.msk.f32.mxu1 %vm2716_vm0, %v2717_v9  ;;  %v739_v10 = vld [vmem:[#allocation11 + $0x10] sm:$0xff]  ;;  %v740_v11 = vld [vmem:[#allocation11 + $0x18] sm:$0xff]  ;;  %2137 = vmatprep.mubr.msk.f32.mxu0 %vm2716_vm0, %v2717_v9  ;;  %v2223_v12 = vpack.c.bf16 %v825_v7, %v824_v6  ;;  %v3155_v15 = vld [vmem:[%s604_s5] sm:$0xff]  ;;  %s2718_s6 = smov 120   ;;  %s2719_s22 = smov 112   ;;  %vm1677_vm3 = vcmask 130048  }
 0x10c   : > { %2221 = vmatpush3.bf16.msra.mxu1 %v2220_v4  ;;  %v2217_v13 = vpack.c.bf16 %v740_v11, %v739_v10  ;;  %v735_v14 = vld [vmem:[%s613_s10] sm:$0xff]  ;;  %v2068_v16 = vld [vmem:[%s3331_s7] ss:$0 sm:$0xff]  ;;  %s2720_s24 = smov 104   ;;  %v907_v25 = vld [vmem:[#allocation14 + $0x8] sm:$0xff]  ;;  %s3405_s28 = sld [smem:[#allocation35_spill]] }
 0x10d   : > { %2215 = vmatpush3.bf16.msra.mxu0 %v2214_v8  ;;  %2222 = vmatprep.subr.bf16.mxu1 %v2715_v3  ;;  %v906_v24 = vld [vmem:[#allocation14] sm:$0xff]  ;;  %v908_v26 = vld [vmem:[#allocation14 + $0x10] sm:$0xff]  ;;  %v909_v28 = vld [vmem:[#allocation14 + $0x18] sm:$0xff]  ;;  %s2078_s1 = sld [smem:[#allocation15 + $0x1]]  ;;  %s3406_s18 = sld [smem:[#allocation36_spill]]  ;;  %vm1679_vm4 = vcmask 195584  }
 0x10e   : > { %2216 = vmatprep.subr.bf16.mxu0 %v2715_v3  ;;  %v2226_v27 = vpack.c.bf16 %v907_v25, %v906_v24  ;;  %v2229_v29 = vpack.c.bf16 %v909_v28, %v908_v26  ;;  %v736_v30 = vld [vmem:[%s622_s9] sm:$0xff]  ;;  %v990_v31 = vld [vmem:[%s631_s23] sm:$0xff]  ;;  %s3407_s23 = sld [smem:[#allocation37_spill]]  ;;  %s2082_s14 = sld [smem:[#allocation15 + $0x2]] }
 0x10f   : > { %s2722_s19 = smov 16   ;;  %s2723_s29 = smov 24  }
 0x110   : > { %2224 = vmatpush3.bf16.msra.mxu1 %v2223_v12  ;;  %v2066_v17 = vld [vmem:[%s3404_s15] ss:$0 sm:$0xff]  ;;  %s3410_s9 = sld [smem:[#allocation38_spill]]  ;;  %s2724_s16 = smov [#allocation16]  }
 0x111   : > { %2218 = vmatpush3.bf16.msra.mxu0 %v2217_v13  ;;  %2162 = vmatprep.subr.mxu1 %v2717_v9  ;;  %s2605_s21 = sshll.u32 %s2724_s16, 4  ;;  %s2606_s21 = int_to_ptr.vmem [resolvable:$false] %s2605_s21 }
 0x112   : > { %2225 = vmatprep.subr.bf16.mxu0 %v2715_v3  ;;  %v2070_v41 = vld [vmem:[%s3405_s28] ss:$0 sm:$0xff]  ;;  %s1153_s28 = sld [smem:[#allocation15]]  ;;  %s2607_s4 = scalar_lea.vmem %s2606_s21, 256 }
 0x113   : > { %2149 = vmatmul.mubr.msk.f32.vlgmr.msra.gmra.mrb[0].mxu1 %vm748_vm1, %v735_v14 }
 0x114   : > { %2138 = vmatmul.mubr.msk.f32.vlgmr.msra.gmra.mrb[0].mxu0 %vm748_vm1, %v3155_v15  ;;  %2164 = vmatprep.mubr.msk.f32.mxu1 %vm2716_vm0, %v2717_v9 }
 0x115   : > { %2159 = vmatprep.mubr.msk.f32.mxu0 %vm2716_vm0, %v2717_v9  ;;  %2227 = vmatpush3.bf16.msra.mxu0 %v2226_v27 }
 0x116   : > { %2228 = vmatprep.subr.bf16.mxu0 %v2715_v3 }
 0x119   : > { %2230 = vmatpush3.bf16.msra.mxu0 %v2229_v29 }
 0x11a   : > { %2182 = vmatprep.subr.mxu0 %v2717_v9 }
 0x11c   : > { %2160 = vmatmul.mubr.msk.f32.vlgmr.msra.gmra.mrb[2].mxu0 %vm748_vm1, %v736_v30 }
 0x11d   : > { %2184 = vmatprep.mubr.msk.f32.mxu0 %vm2716_vm0, %v2717_v9 }
 0x1e6   : > { %v902_v18 = vpop.f32.mrb[0].mxu1 }
 0x1e7   : > { %v903_v19 = vadd.f32 %v2068_v16, %v902_v18  ;;  %v2150_v20 = vpop.f32.mrb[1].mxu1  ;;  %v818_v21 = vpop.f32.mrb[0].mxu0 }
 0x1e8   : > { %v819_v22 = vadd.f32 %v2066_v17, %v818_v21  ;;  %v2139_v23 = vpop.f32.mrb[1].mxu0 }
 0x1e9   : > { %1158 = vrot.lane.b32.xlu1 %v903_v19, %s2718_s6  ;;  %2163 = vmatpush3.xpose.msk.msra.mxu1 %vm991_vm2, %v903_v19 }
 0x1ea   : > { %2167 = vmatprep.subr.mxu1 %v2717_v9 }
 0x1ec   : > { %2165 = vmatmul.mubr.msk.f32.vlgmr.msra.gmra.mrb[2].mxu1 %vm991_vm2, %v819_v22 }
 0x1ed   : > { %1156 = vrot.lane.b32.xlu1 %v819_v22, %s2718_s6  ;;  %2169 = vmatprep.mubr.msk.f32.mxu1 %vm2716_vm0, %v2717_v9 }
 0x1ef   : > { %v986_v42 = vpop.f32.mrb[2].mxu0 }
 0x1f0   : > { %v3196_v43 = vadd.f32 %v2070_v41, %v986_v42  ;;  %v2161_v44 = vpop.f32.mrb[3].mxu0  ;;  %v1324_v41 = vstv %s2078_s1  ;;  %s3409_s1 = sld [smem:[#allocation29_spill]] }
 0x1f1   : > { %1326 = vrot.lane.b32.xlu1 %v819_v22, %s2719_s22  ;;  %v1493_v44 = vstv %s2082_s14 }
 0x1f2   : > { %2168 = vmatpush3.msra.mxu1 %v3196_v43 }
 0x1f3   : > { %2172 = vmatprep.subr.mxu1 %v2717_v9 }
 0x1f5   : > { %1497 = vrot.lane.b32.xlu1 %v903_v19, %s2720_s24 }
 0x1f6   : > { %p3411_p12 = scmp.ne.s32.totalorder %s3409_s1, 0 }
 0x1f9   : > { %1495 = vrot.lane.b32.xlu1 %v819_v22, %s2720_s24 }
 0x25b   : > { %v1159_v45 = vpop.permute.xlu1 %1158 }
 0x25f   : > { %v1157_v46 = vpop.permute.xlu1 %1156 }
 0x263   : > { %v1327_v47 = vpop.permute.xlu1 %1326 }
 0x267   : > { %v1498_v50 = vpop.permute.xlu1 %1497 }
 0x26b   : > { %v1496_v52 = vpop.permute.xlu1 %1495 }
 0x2bf   : > { %v1064_v32 = vpop.f32.mrb[2].mxu1 }
 0x2c0   : > { %v1065_v33 = vadd.f32 %v1064_v32, %v990_v31  ;;  %v2166_v34 = vpop.f32.mrb[3].mxu1 }
 0x2c1   : > { %v1695_v34 = vld [vmem:[%s3406_s18] sm:$0xff] }
 0x2c2   : > { %v1068_v35 = vsel %vm991_vm2, %v1065_v33, -inf }
 0x2c3   : > { %1069 = vmax.xlane.f32.xlu0 %v1068_v35  ;;  %v1696_v35 = vld [vmem:[%s3406_s18 + $0x8] sm:$0xff] }
 0x350   : > { %v1070_v36 = vpop.xlane.xlu0 %1069 }
 0x351   : > { %v1071_v37 = vsub.f32 %v1065_v33, %v1070_v36  ;;  %v2232_v36 = vpack.c.bf16 %v1696_v35, %v1695_v34 }
 0x353   : > { %v1072_v38 = vmul.f32 1.442695, %v1071_v37  ;;  %v2087_v37 = vld [vmem:[%s3407_s23] ss:$0 sm:$0xff]  ;;  %s1775_s23 = scalar_lea.sflag [#allocation4], %s3108_s11 }
 0x355   : > { %2366 = vpow2.f32 %v1072_v38  ;;  %v1698_v38 = vld [vmem:[%s3406_s18 + $0x18] sm:$0xff] }
 0x35f   : > { %v2367_v39 = vpop.eup %2366 }
 0x360   : > { %v1074_v40 = vsel %vm991_vm2, %v2367_v39, 0.0 }
 0x361   : > { %1075 = vadd.xlane.f32.xlu0 %v1074_v40  ;;  %v1692_v40 = vadd.f32 %v2087_v37, %v3155_v15 }
 0x377   : > { %1328 = vrot.lane.b32.xlu0 %v903_v19, %s2719_s22 }
 0x3ee   : > { %v1076_v48 = vpop.xlane.xlu0 %1075 }
 0x3ef   : > { %2368 = vrcp.f32 %v1076_v48 }
 0x3f2   : > { %v1329_v49 = vpop.permute.xlu0 %1328 }
 0x3f3   : > { %2183 = vmatpush3.xpose.msk.msra.mxu0 %vm991_vm2, %v1329_v49 }
 0x3f4   : > { %2192 = vmatprep.subr.mxu0 %v2717_v9 }
 0x3f6   : > { %2185 = vmatmul.mubr.msk.f32.vlgmr.msra.gmra.mrb[4].mxu0 %vm991_vm2, %v1327_v47 }
 0x3f7   : > { %2193 = vmatpush3.xpose.msk.msra.mxu0 %vm991_vm2, %v1498_v50  ;;  %2194 = vmatprep.mubr.msk.f32.mxu0 %vm2716_vm0, %v2717_v9 }
 0x3f8   : > { %2231 = vmatprep.subr.bf16.mxu0 %v2715_v3 }
 0x3f9   : > { %v2369_v51 = vpop.eup %2368 }
 0x3fa   : > { %v1078_v53 = vmul.f32 %v2369_v51, %v2367_v39  ;;  %2195 = vmatmul.mubr.msk.f32.vlgmr.msra.gmra.mrb[6].mxu0 %vm991_vm2, %v1496_v52  ;;  %v1154_v51 = vstv %s1153_s28 }
 0x3fb   : > { %2210 = vmatprep.mubr.msk.f32.mxu0 %vm2716_vm0, %v2717_v9  ;;  %2233 = vmatpush3.bf16.msra.mxu0 %v2232_v36 }
 0x3fc   : > { %2170 = vmatmul.mubr.msk.f32.vlgmr.msra.gmra.mrb[4].mxu1 %vm991_vm2, %v1078_v53  ;;  %2234 = vmatprep.subr.bf16.mxu0 %v2715_v3 }
 0x3fd   : > { %2173 = vmatpush3.xpose.msk.msra.mxu1 %vm991_vm2, %v1159_v45  ;;  %2174 = vmatprep.mubr.msk.f32.mxu1 %vm2716_vm0, %v2717_v9 }
 0x3fe   : > { %2177 = vmatprep.subr.mxu1 %v2717_v9 }
 0x400   : > { %2175 = vmatmul.mubr.msk.f32.vlgmr.msra.gmra.mrb[6].mxu1 %vm991_vm2, %v1157_v46 }
 0x401   : > { %2179 = vmatprep.mubr.msk.f32.mxu1 %vm2716_vm0, %v2717_v9 }
 0x4c9   : > { %v1400_v54 = vpop.f32.mrb[4].mxu0 }
 0x4ca   : > { %v1401_v55 = vadd.f32 %v1400_v54, %v990_v31  ;;  %v2186_v56 = vpop.f32.mrb[5].mxu0 }
 0x4cc   : > { %v1404_v57 = vsel %vm991_vm2, %v1401_v55, -inf }
 0x4cd   : > { %1405 = vmax.xlane.f32.xlu0 %v1404_v57  ;;  %v1569_v58 = vpop.f32.mrb[6].mxu0 }
 0x4ce   : > { %v2196_v59 = vpop.f32.mrb[7].mxu0  ;;  %v1570_v1 = vadd.f32 %v1569_v58, %v990_v31 }
 0x4cf   : > { %v3220_v60 = vpop.f32.mrb[4].mxu1 }
 0x4d0   : > { %v2171_v61 = vpop.f32.mrb[5].mxu1  ;;  %v1573_v4 = vsel %vm991_vm2, %v1570_v1, -inf  ;;  %v1155_v53 = vmul.f32 %v1154_v51, %v3220_v60 }
 0x4d3   : > { %v1230_v62 = vpop.f32.mrb[6].mxu1 }
 0x4d4   : > { %v1231_v63 = vadd.f32 %v1230_v62, %v990_v31  ;;  %v2176_v0 = vpop.f32.mrb[7].mxu1 }
 0x4d6   : > { %v1234_v2 = vsel %vm991_vm2, %v1231_v63, -inf }
 0x4d7   : > { %1235 = vmax.xlane.f32.xlu1 %v1234_v2 }
 0x4db   : > { %1574 = vmax.xlane.f32.xlu1 %v1573_v4 }
 0x55a   : > { %v1406_v5 = vpop.xlane.xlu0 %1405 }
 0x55b   : > { %v1407_v6 = vsub.f32 %v1401_v55, %v1406_v5 }
 0x55d   : > { %v1408_v7 = vmul.f32 1.442695, %v1407_v6 }
 0x55f   : > { %2370 = vpow2.f32 %v1408_v7 }
 0x564   : > { %v1236_v8 = vpop.xlane.xlu1 %1235 }
 0x565   : > { %v1237_v18 = vsub.f32 %v1231_v63, %v1236_v8 }
 0x567   : > { %v1238_v19 = vmul.f32 1.442695, %v1237_v18 }
 0x568   : > { %v1575_v10 = vpop.xlane.xlu1 %1574 }
 0x569   : > { %v2371_v11 = vpop.eup %2370  ;;  %v1576_v12 = vsub.f32 %v1570_v1, %v1575_v10 }
 0x56a   : > { %v1410_v13 = vsel %vm991_vm2, %v2371_v11, 0.0 }
 0x56b   : > { %v1577_v14 = vmul.f32 1.442695, %v1576_v12  ;;  %1411 = vadd.xlane.f32.xlu0 %v1410_v13 }
 0x56d   : > { %2372 = vpow2.f32 %v1577_v14 }
 0x56e   : > { %2374 = vpow2.f32 %v1238_v19 }
 0x577   : > { %v2373_v16 = vpop.eup %2372 }
 0x578   : > { %v1579_v17 = vsel %vm991_vm2, %v2373_v16, 0.0  ;;  %v2375_v20 = vpop.eup %2374 }
 0x579   : > { %1580 = vadd.xlane.f32.xlu1 %v1579_v17  ;;  %v1240_v21 = vsel %vm991_vm2, %v2375_v20, 0.0 }
 0x581   : > { %1246 = vrot.lane.b32.xlu0 %v3196_v43, %s2718_s6  ;;  %s2086_s6 = sld [smem:[#allocation15 + $0x3]] }
 0x587   : > { %v1662_v48 = vstv %s2086_s6 }
 0x58a   : > { %1415 = vrot.lane.b32.xlu1 %v3196_v43, %s2719_s22  ;;  %s3260_s22 = scalar_lea.vmem [#allocation16], %s3111_s17  ;;  %s3408_s17 = sld [smem:[#allocation25_spill]] }
 0x58b   : > { %1693 = vst.msk [vmem:[%s3260_s22] sm:$0xff] %vm748_vm1, %v1692_v40  ;;  %s1789_s5 = sshll.u32 %s3260_s22, 4  ;;  %s3275_s5 = int_to_ptr.vmem [resolvable:$true] %s1789_s5 }
 0x58c   : > { %s2601_s14 = scalar_lea.vmem %s3275_s5, 128  ;;  %p2608_p3 = scmp.lt.s32.totalorder %s3275_s5, %s2606_s21 }
 0x58d   : > { %p2602_p4 = scmp.ne.s32.totalorder %s3275_s5, %s2601_s14  ;;  %p2609_p9 = scmp.lt.s32.totalorder %s2607_s4, %s2601_s14 }
 0x58f   : > { %p2603_p7 = pnand %p2602_p4, %p3411_p12  ;;  %p2610_p1 = por %p2609_p9, %p2608_p3 }
 0x590   : > { %s2090_s20 = sshll.u32 %s3408_s17, 7 }
 0x591   : > { %s3273_s13 = scalar_lea.hbm %s3410_s9, %s2090_s20  ;;  %p2604_p11 = pneg %p2603_p7 }
 0x592   : > { %v1694_v59 = vld [vmem:[%s3260_s22] sm:$0xff] }
 0x593   : > { %p2611_p6 = pnand %p2610_p1, %p2604_p11 }
 0x5ae   : > { %1241 = vadd.xlane.f32.xlu1 %v1240_v21 }
 0x5bf   : > { %1584 = vrot.lane.b32.xlu1 %v3196_v43, %s2720_s24  ;;  %s2721_s24 = smov 8  }
 0x5f8   : > { %v1412_v22 = vpop.xlane.xlu0 %1411 }
 0x5fc   : > { %v1247_v23 = vpop.permute.xlu0 %1246 }
 0x5fd   : > { %2178 = vmatpush3.msra.mxu1 %v1247_v23 }
 0x5fe   : > { %2187 = vmatprep.subr.mxu1 %v2717_v9 }
 0x606   : > { %v1581_v24 = vpop.xlane.xlu1 %1580 }
 0x60a   : > { %v1416_v25 = vpop.permute.xlu1 %1415 }
 0x63b   : > { %v1242_v26 = vpop.xlane.xlu1 %1241 }
 0x63c   : > { %2376 = vrcp.f32 %v1242_v26 }
 0x63d   : > { %2378 = vrcp.f32 %v1412_v22 }
 0x63e   : > { %2380 = vrcp.f32 %v1581_v24 }
 0x63f   : > { %v1585_v32 = vpop.permute.xlu1 %1584 }
 0x646   : > { %v2377_v27 = vpop.eup %2376 }
 0x647   : > { %v1244_v28 = vmul.f32 %v2377_v27, %v2375_v20  ;;  %v2379_v29 = vpop.eup %2378 }
 0x648   : > { %v1414_v30 = vmul.f32 %v2379_v29, %v2371_v11  ;;  %v2381_v31 = vpop.eup %2380 }
 0x649   : > { %2180 = vmatmul.mubr.msk.f32.vlgmr.msra.gmra.mrb[8].mxu1 %vm991_vm2, %v1244_v28  ;;  %v1583_v33 = vmul.f32 %v2381_v31, %v2373_v16 }
 0x64a   : > { %2188 = vmatpush3.msra.mxu1 %v1416_v25  ;;  %2189 = vmatprep.mubr.msk.f32.mxu1 %vm2716_vm0, %v2717_v9 }
 0x64b   : > { %2197 = vmatprep.subr.mxu1 %v2717_v9 }
 0x64d   : > { %2190 = vmatmul.mubr.msk.f32.vlgmr.msra.gmra.mrb[10].mxu1 %vm991_vm2, %v1414_v30 }
 0x64e   : > { %2198 = vmatpush3.msra.mxu1 %v1585_v32  ;;  %2199 = vmatprep.mubr.msk.f32.mxu1 %vm2716_vm0, %v2717_v9  ;;  %v1697_v9 = vld [vmem:[%s3406_s18 + $0x10] sm:$0xff] }
 0x64f   : > { %v2235_v39 = vpack.c.bf16 %v1698_v38, %v1697_v9 }
 0x651   : > { %2200 = vmatmul.mubr.msk.f32.vlgmr.msra.gmra.mrb[12].mxu1 %vm991_vm2, %v1583_v33  ;;  %2236 = vmatpush3.bf16.msra.mxu0 %v2235_v39 }
 0x71c   : > { %v1318_v42 = vpop.f32.mrb[8].mxu1 }
 0x71d   : > { %v1325_v3 = vmul.f32 %v1324_v41, %v1318_v42  ;;  %v2181_v43 = vpop.f32.mrb[9].mxu1 }
 0x71f   : > { %1665 = vrot.lane.b32.xlu0 %v1325_v3, %s2721_s24 }
 0x720   : > { %v1487_v45 = vpop.f32.mrb[10].mxu1 }
 0x721   : > { %v1494_v46 = vmul.f32 %v1493_v44, %v1487_v45  ;;  %v2191_v47 = vpop.f32.mrb[11].mxu1 }
 0x723   : > { %1669 = vrot.lane.b32.xlu1 %v1494_v46, %s2722_s19 }
 0x724   : > { %v1656_v15 = vpop.f32.mrb[12].mxu1 }
 0x725   : > { %v1663_v49 = vmul.f32 %v1662_v48, %v1656_v15  ;;  %v2201_v50 = vpop.f32.mrb[13].mxu1 }
 0x727   : > { %1673 = vrot.lane.b32.xlu0 %v1663_v49, %s2723_s29 }
 0x791   : > { %v1666_v52 = vpop.permute.xlu0 %1665 }
 0x792   : > { %v1676_v55 = vsel %vm991_vm2, %v1155_v53, %v1666_v52 }
 0x795   : > { %v1670_v54 = vpop.permute.xlu1 %1669 }
 0x796   : > { %v1678_v56 = vsel %vm1677_vm3, %v1676_v55, %v1670_v54 }
 0x799   : > { %v1674_v57 = vpop.permute.xlu0 %1673 }
 0x79a   : > { %v1680_v58 = vsel %vm1679_vm4, %v1678_v56, %v1674_v57 }
 0x79b   : > { %2211 = vmatmul.mubr.msk.f32.vlgmr.msra.gmra.mrb[8].mxu0 %vm748_vm1, %v1680_v58 }
 0x86e   : > { %v1768_v61 = vpop.f32.mrb[8].mxu0 }
 0x86f   : > { %v1772_v62 = vadd.f32 %v1768_v61, %v1694_v59  ;;  %v2212_v63 = vpop.f32.mrb[9].mxu0 }
 0x871   : > { %1773 = vst.msk [vmem:[%s3260_s22] sm:$0xff] %vm748_vm1, %v1772_v62 }
 0x872   : > { %2614 = shalt.err (!%p2611_p6)
}
 0x873   : > { %s2615_s11 = scalar_lea.hbm %s3273_s13, 128  ;;  %s2619_s22 = scalar_lea.hbm %s3410_s9, 256 }
 0x874   : > { %p2616_p13 = scmp.ne.s32.totalorder %s3273_s13, %s2615_s11  ;;  %p2620_p2 = scmp.lt.u32.totalorder %s3273_s13, %s3410_s9 }
 0x875   : > { %p2621_p5 = scmp.lt.u32.totalorder %s2619_s22, %s2615_s11  ;;  %p2623_p4 = scmp.lt.u32.totalorder %s2615_s11, %s3273_s13 }
 0x876   : > { %p2617_p0 = pnand %p2616_p13, %p3411_p12 }
 0x877   : > { %p2622_p10 = por %p2621_p5, %p2620_p2 }
 0x878   : > { %p2618_p8 = pneg %p2617_p0 }
 0x879   : > { %p2624_p7 = por %p2623_p4, %p2622_p10 }
 0x87b   : > { %p2625_p11 = pnand %p2624_p7, %p2618_p8 }
 0x87d   : > { %2628 = shalt.err (!%p2625_p11)
}
 0x87e   : > { %2261 = dma.vmem_to_hbm [thread:$0]  (%p3411_p12), %s3275_s5, 128, %s3273_s13, %s1775_s23  }
 0x87f PF: > { %s3412_s17 = sld [smem:[#allocation24_spill]]  ;;  %s3413_s29 = sld [smem:[#allocation27_spill]] }
 0x880   : > { %p3415_p9 = scmp.ge.s32.totalorder %s2703_s30, 2 }
 0x885   : > { %s1801_s28 = sand.u32 1, %s3412_s17   ;;  %p3414_p3 = scmp.ne.s32.totalorder %s3413_s29, 0 }
 0x886   : > { %s1802_s20 = scalar_lea.sflag [#allocation4], %s1801_s28 }
 0x887   : > { %p2290_p1 = pnand %p3415_p9, %p3414_p3 }
 0x889   : > { %2678 = dma.done.wait (!%p2290_p1), %s1802_s20, 128  }
 0x88a   : > { %2680 = vsyncadd (!%p2290_p1), %s1802_s20, 4294967168  ;;  %s37_s30 = sadd.s32 1, %s2703_s30   ;;  %s3416_s1 = sld [smem:[#allocation30_spill]] }
 0x88b   : > { %p34_p6 = scmp.ge.s32.totalorder %s37_s30, 4   ;;  %s3417_s28 = sld [smem:[#allocation26_spill]] }
 0x88c   : > { %s3418_s29 = sld [smem:[#allocation28_spill]]  ;;  %s3419_s25 = smov %s2687_s26 }
 0x88d   : > { %s3420_s26 = smov %s2691_s27  ;;  %36 = sbr.rel (!%p34_p6) target bundleno = 21 (0x15), region = 190 }
 0x890   : > { %s3421_s27 = smov %s3416_s1 }
 0x894   :  { %1807 = vsyncpa [#allocation3], 1 }
 0x895   :  { %1809 = vsyncpa [#allocation3 + $0x1], 1 }
 0x896   :  { %1810 = vsyncpa [#allocation7], 1 }
 0x897   :  { %1812 = vsyncpa [#allocation7 + $0x1], 1 }
 0x898   :  { %1813 = vsyncpa [#allocation10], 1 }
 0x899   :  { %1815 = vsyncpa [#allocation10 + $0x1], 1 }
 0x89a   :  { %1816 = vsyncpa [#allocation13], 1 }
 0x89b   :  { %1817 = vsyncpa [#allocation4], 1 }
 0x89c   :  { %1819 = vsyncpa [#allocation4 + $0x1], 1 }
 0x89d   :  { %1820 = vsyncpa [#allocation5], 1 }
 0x89e   :  { %1822 = vsyncpa [#allocation5 + $0x1], 1 }

</bundles_post_ra>
